<compile_context>
chip_gen: v7x
topology: tpu7x:2x2x1
jax: 0.10.0
libtpu: 0.0.40
codegen_flags: <defaults>
</compile_context>

<pallas_src>
import jax
import jax.numpy as jnp
from jax.experimental import pallas as pl
from jax.experimental.pallas import tpu as pltpu


def _repeat_kernel(x_ref, o_ref):
    """x_ref: (1, Cb, Hb, W);  o_ref: (1, Cb, RH*Hb, RW*W)."""
    x = x_ref[0]                              # (Cb, Hb, W)
    h, w = x.shape[-2], x.shape[-1]
    rh = o_ref.shape[-2] // h                 # static
    rw = o_ref.shape[-1] // w                 # static

    if rh == 1 and rw == 1:
        o_ref[0] = x
        return

    if rh == 1 and w % 128 != 0:
        # Odd widths: slice stores at non-128-aligned offsets would be masked
        # partial stores; a single lane-dense full-block store is better.
        o_ref[0] = jnp.concatenate([x] * rw, axis=-1)
        return

    # Direct slice stores: one vreg-resident input tile, R (or R*R on the
    # fallback path) lane-aligned stores straight into the output buffer.
    for i in range(rh):
        for j in range(rw):
            o_ref[0, :, pl.ds(i * h, h), pl.ds(j * w, w)] = x


def _vmem_budgets():
    """(vmem_limit_bytes, per-step tile budget) per TPU generation."""
    try:
        cap = pltpu.get_tpu_info().vmem_capacity_bytes
    except Exception:
        cap = 128 * 1024 * 1024
    if cap <= 64 * 1024 * 1024:
        # v7x: 64 MiB physical per TC -> leave headroom for Mosaic scratch.
        return 48 * 1024 * 1024, 20 * 1024 * 1024
    # v5e / v6e: 128 MiB physical.
    return 96 * 1024 * 1024, 40 * 1024 * 1024


def _sublane_multiple(itemsize):
    # Sub-32-bit dtypes pack along sublanes: f32 -> 8, bf16 -> 16, int8 -> 32.
    return 8 * (4 // itemsize)


def _pick_tiles(C, H, W, R, itemsize, sub, budget_bytes):
    """Largest (TC, TH) with TH | H, TH % sub == 0, TC | C, keeping the
    double-buffered (input + output) per-step footprint under budget."""
    def step_bytes(tc, th):
        return 2 * tc * th * W * (1 + R) * itemsize   # 2 buffers x (in + out)

    th, tc = H, C
    while step_bytes(tc, th) > budget_bytes and th % 2 == 0 and (th // 2) % sub == 0:
        th //= 2
    while step_bytes(tc, th) > budget_bytes and tc % 2 == 0:
        tc //= 2
    return tc, th


def image_repeat(x, num_repeats):
    """Pallas ImageRepeatLayer.forward:  (N, C, H, W) -> (N, C, R*H, R*W)."""
    N, C, H, W = x.shape
    R = int(num_repeats)
    assert R >= 1
    itemsize = jnp.dtype(x.dtype).itemsize
    sub = _sublane_multiple(itemsize)
    vmem_limit, tile_budget = _vmem_budgets()
    out_shape = jax.ShapeDtypeStruct((N, C, R * H, R * W), x.dtype)
    cost = pl.CostEstimate(
        flops=0, transcendentals=0,
        bytes_accessed=int(x.size) * itemsize * (1 + R * R))

    # NOTE: lane-dense stores (the main perf lever) assume W % 128 == 0; for
    # odd widths the kernel falls back to a concat + full-block store.

    if R > 1 and H % sub != 0:
        # Fallback: whole-image blocks (block == full spatial extent, so the
        # (8,128) tiling constraint does not apply).
        # TODO(synk): tile H with padded/masked output rows instead of whole
        # images when C*H*W*R*R is too large for VMEM.
        return pl.pallas_call(
            _repeat_kernel,
            out_shape=out_shape,
            grid_spec=pltpu.PrefetchScalarGridSpec(
                num_scalar_prefetch=0,
                grid=(N,),
                in_specs=[pl.BlockSpec((1, C, H, W), lambda n: (n, 0, 0, 0))],
                out_specs=pl.BlockSpec((1, C, R * H, R * W),
                                       lambda n: (n, 0, 0, 0)),
            ),
            compiler_params=pltpu.CompilerParams(
                dimension_semantics=("parallel",),
                vmem_limit_bytes=vmem_limit,
            ),
            cost_estimate=cost,
        )(x)

    TC, TH = _pick_tiles(C, H, W, R, itemsize, sub, tile_budget)
    n_ch = C // TC
    n_row = H // TH
    grid = (N, n_ch, n_row, R)

    in_spec = pl.BlockSpec((1, TC, TH, W),
                           lambda n, cb, hb, rh: (n, cb, hb, 0))
    out_spec = pl.BlockSpec((1, TC, TH, R * W),
                            lambda n, cb, hb, rh: (n, cb, rh * n_row + hb, 0))

    # Megacore: make sure at least 2 blocks exist on the parallel axes; if
    # not, also shard the R axis (second TC only re-reads the small input
    # tile -- negligible vs. the output writeback).
    semantics = ["parallel", "parallel", "parallel", "arbitrary"]
    if N * n_ch * n_row < 2 and R > 1:
        semantics[3] = "parallel"

    return pl.pallas_call(
        _repeat_kernel,
        out_shape=out_shape,
        grid_spec=pltpu.PrefetchScalarGridSpec(
            num_scalar_prefetch=0,
            grid=grid,
            in_specs=[in_spec],
            out_specs=out_spec,
        ),
        compiler_params=pltpu.CompilerParams(
            dimension_semantics=tuple(semantics),
            vmem_limit_bytes=vmem_limit,
        ),
        cost_estimate=cost,
    )(x)


if __name__ == "__main__":
    key = jax.random.PRNGKey(0)
    N, C, H, W = 2, 4, 16, 16
    num_repeats = 2

    x = jax.random.normal(key, (N, C, H, W), jnp.float32)

    out = jax.block_until_ready(image_repeat(x, num_repeats))

    # Reference: torch.Tensor.repeat(1, 1, R, R) == spatial tiling.
    ref = jnp.tile(x, (1, 1, num_repeats, num_repeats))

    assert out.shape == (N, C, num_repeats * H, num_repeats * W), out.shape
    assert bool(jnp.array_equal(out, ref)), float(jnp.max(jnp.abs(out - ref)))
    print("KERNEL_OK")
</pallas_src>

<mosaic_0001>
module attributes {stable_mosaic.version = 11 : i64} {
  func.func @_repeat_kernel(%arg0: i32, %arg1: i32, %arg2: i32, %arg3: i32, %arg4: memref<1x4x16x16xf32, #tpu.memory_space<vmem>>, %arg5: memref<1x4x16x32xf32, #tpu.memory_space<vmem>>) attributes {dimension_semantics = [#tpu.dimension_semantics<parallel>, #tpu.dimension_semantics<parallel>, #tpu.dimension_semantics<parallel>, #tpu.dimension_semantics<arbitrary>], iteration_bounds = array<i64: 2, 1, 1, 2>, scalar_prefetch = 0 : i64, scratch_operands = 0 : i64, tpu.core_type = #tpu.core_type<tc>, window_params = [{transform_indices = @transform_0, window_bounds = array<i64: 1, 4, 16, 16>}, {transform_indices = @transform_1, window_bounds = array<i64: 1, 4, 16, 32>}]} {
    %c0 = arith.constant 0 : index
    %c0_0 = arith.constant 0 : index
    %c0_1 = arith.constant 0 : index
    %c0_2 = arith.constant 0 : index
    %0 = vector.load %arg4[%c0, %c0_0, %c0_1, %c0_2] : memref<1x4x16x16xf32, #tpu.memory_space<vmem>>, vector<1x4x16x16xf32>
    %1 = vector.shape_cast %0 : vector<1x4x16x16xf32> to vector<4x16x16xf32>
    %2 = tpu.concatenate %1, %1 in 2 : vector<4x16x16xf32>, vector<4x16x16xf32> -> vector<4x16x32xf32>
    %c0_3 = arith.constant 0 : index
    %c0_4 = arith.constant 0 : index
    %c0_5 = arith.constant 0 : index
    %c0_6 = arith.constant 0 : index
    %3 = vector.load %arg5[%c0_3, %c0_4, %c0_5, %c0_6] : memref<1x4x16x32xf32, #tpu.memory_space<vmem>>, vector<1x4x16x32xf32>
    %4 = vector.shape_cast %3 : vector<1x4x16x32xf32> to vector<4x16x32xf32>
    %5 = vector.shape_cast %2 : vector<4x16x32xf32> to vector<1x4x16x32xf32>
    tpu.vector_store %arg5[%c0_3, %c0_4, %c0_5, %c0_6], %5 {strides = array<i32>} : memref<1x4x16x32xf32, #tpu.memory_space<vmem>>, vector<1x4x16x32xf32>,
    return
  }
  func.func @transform_0(%arg0: i32, %arg1: i32, %arg2: i32, %arg3: i32) -> (i32, i32, i32, i32) {
    %c0_i32 = arith.constant 0 : i32
    %c0_i32_0 = arith.constant 0 : i32
    return %arg0, %arg1, %arg2, %c0_i32 : i32, i32, i32, i32
  }
  func.func @transform_1(%arg0: i32, %arg1: i32, %arg2: i32, %arg3: i32) -> (i32, i32, i32, i32) {
    %c1_i32 = arith.constant 1 : i32
    %0 = arith.muli %arg3, %c1_i32 : i32
    %1 = arith.addi %0, %arg2 : i32
    %c0_i32 = arith.constant 0 : i32
    %c0_i32_0 = arith.constant 0 : i32
    return %arg0, %arg1, %1, %c0_i32 : i32, i32, i32, i32
  }
}

</mosaic_0001>

<bundles_post_ra>
// kernel: tpu_custom_call.1
= control target key start
LH: loop header
LB: loop body
LE: loop exit
PB: predicated region body
PF: predicated region fallthrough
CT: control target
= control target key end

     0   :  { %6 = vsyncpa [#allocation3], 0  ;;  %s899_s0 = inlined_call_operand.hbm [shape: f32[2,4,16,16], index: 0, kind: input, shape index: {}]   ;;  %s900_s1 = inlined_call_operand.hbm [shape: f32[2,4,32,32], index: 1, kind: output, shape index: {}]  }
   0x1   :  { %8 = vsyncpa [#allocation3 + $0x1], 0 }
   0x2   :  { %9 = vsyncpa [#allocation4], 0 }
   0x3   :  { %11 = vsyncpa [#allocation4 + $0x1], 0  ;;  %s671_s6 = smov 0   ;;  %s673_s7 = smov 0  }
   0x4   :  { %s675_s8 = smov 0   ;;  %s677_s9 = smov 0  }
   0x5   :  { %s679_s10 = smov 0   ;;  %s681_s11 = smov 0  }
   0x6   :  { %s683_s12 = smov 0   ;;  %s685_s13 = smov 0  }
   0x7   :  { %s687_s14 = smov 0   ;;  %s689_s15 = smov 0  }
   0x8   :  { %s691_s16 = smov 0  }
   0x9 LB: > { %s389_s17 = sadd.s32 4294967295, %s648_s16   ;;  %s390_s18 = sadd.s32 4294967294, %s648_s16   ;;  %s648_s16 = sphi %s691_s16, %s17_s16   ;;  %s644_s15 = sphi %s689_s15, %s919_s15   ;;  %s640_s14 = sphi %s687_s14, %s918_s14   ;;  %s636_s13 = sphi %s685_s13, %s917_s13   ;;  %s632_s12 = sphi %s683_s12, %s916_s12   ;;  %s628_s11 = sphi %s681_s11, %s915_s11   ;;  %s624_s10 = sphi %s679_s10, %s914_s10   ;;  %s620_s9 = sphi %s677_s9, %s913_s9   ;;  %s616_s8 = sphi %s675_s8, %s912_s8   ;;  %s612_s7 = sphi %s673_s7, %s911_s7   ;;  %s608_s6 = sphi %s671_s6, %s910_s6  }
   0xa   : > { %s32_s19 = sadd.s32 1, %s640_s14  ;;  %s43_s20 = sadd.s32 1, %s644_s15 }
   0xb   : > { %p33_p0 = scmp.ge.s32.totalorder %s32_s19, 2  ;;  %s54_s21 = sadd.s32 1, %s628_s11 }
   0xc   : > { %p61_p1 = scmp.ne.s32.totalorder %s628_s11, %s624_s10  ;;  %p62_p2 = scmp.eq.s32.totalorder %s648_s16, 0 }
   0xd   : > { %s921_s19 = smov (%p33_p0, %s32_s19), 0  ;;  %s923_s20 = smov (!%p33_p0, %s43_s20), %s644_s15 }
   0xe   : > { %p735_p3 = por %p62_p2, %p61_p1  ;;  %p67_p4 = scmp.ne.s32.totalorder %s624_s10, %s620_s9 }
   0xf   : > { %p45_p5 = scmp.ge.s32.totalorder %s923_s20, 2  ;;  %p68_p6 = scmp.eq.s32.totalorder %s389_s17, 0 }
  0x10   : > { %s82_s23 = ssub.s32 %s640_s14, %s921_s19  ;;  %s86_s24 = sadd.s32 1, %s616_s8 }
  0x11   : > { %s925_s20 = smov (%p45_p5, %s923_s20), 0  ;;  %p745_p7 = por %p68_p6, %p67_p4 }
  0x12   : > { %p96_p8 = scmp.ne.s32.totalorder %s616_s8, %s612_s7  ;;  %s47_s26 = ssub.s32 %s644_s15, %s925_s20 }
  0x13   : > { %p97_p9 = scmp.eq.s32.totalorder %s389_s17, 3  ;;  %p52_p10 = scmp.eq.s32.totalorder %s47_s26, 0 }
  0x14   : > { %s83_s27 = sor.u32 %s82_s23, %s47_s26  ;;  %p102_p13 = scmp.ne.s32.totalorder %s612_s7, %s608_s6 }
  0x15   : > { %p84_p11 = scmp.eq.s32.totalorder %s83_s27, 0  ;;  %p753_p12 = por %p97_p9, %p96_p8 }
  0x16   : > { %s758_s29 = scalar_select %p52_p10, %s628_s11, %s54_s21  }
  0x17   : > { %s904_s28 = scalar_select %p753_p12, 1, 0 }
  0x18   : > { %s761_s30 = scalar_select %p84_p11, %s616_s8, %s86_s24  }
  0x19   : > { %p103_p0 = scmp.eq.s32.totalorder %s390_s18, 3  ;;  %p424_p1 = scmp.lt.s32.totalorder %s648_s16, 4 }
  0x1a   : > { %s123_s3 = sand.u32 1, %s628_s11   ;;  %s405_s5 = sshll.u32 %s644_s15, 10 }
  0x1b   : > { %p766_p2 = por %p103_p0, %p102_p13  ;;  %s393_s4 = sshll.u32 %s123_s3, 6 }
  0x1c   : > { %s775_s23 = scalar_lea.hbm %s899_s0, %s405_s5  ;;  %s127_s21 = scalar_lea.vmem [#allocation2], %s393_s4 }
  0x1d   : > { %s905_s2 = scalar_select %p766_p2, 1, 0 }
  0x1e   : > { %s139_s24 = sshll.u32 %s127_s21, 4  ;;  %p781_p4 = pnand %p424_p1, %p735_p3  ;;  %s777_s24 = int_to_ptr.vmem [resolvable:$true] %s139_s24 }
  0x1f   : > { %s786_s26 = scalar_lea.sflag [#allocation3], %s123_s3  ;;  %s524_s27 = scalar_lea.hbm %s775_s23, 1024 }
  0x20   : > { %p525_p6 = scmp.ne.s32.totalorder %s775_s23, %s524_s27  ;;  %p526_p8 = pneg %p781_p4 }
  0x21   : > { %s529_s22 = scalar_lea.hbm %s899_s0, 2048  ;;  %p530_p3 = scmp.lt.u32.totalorder %s775_s23, %s899_s0 }
  0x22   : > { %p527_p9 = pnand %p526_p8, %p525_p6  ;;  %p531_p11 = scmp.lt.u32.totalorder %s529_s22, %s524_s27 }
  0x23   : > { %p533_p0 = scmp.lt.u32.totalorder %s524_s27, %s775_s23 }
  0x24   : > { %p528_p10 = pneg %p527_p9  ;;  %p532_p13 = por %p531_p11, %p530_p3 }
  0x26   : > { %p534_p1 = por %p533_p0, %p532_p13 }
  0x28   : > { %p535_p5 = pnand %p534_p1, %p528_p10 }
  0x2a   : > { %538 = shalt.err (!%p535_p5)
}
  0x2b   : > { %s539_s3 = scalar_lea.vmem %s777_s24, 1024  ;;  %s650_s21 = smov [#allocation2]  }
  0x2c   : > { %p540_p6 = scmp.ne.s32.totalorder %s777_s24, %s539_s3  ;;  %s544_s4 = sshll.u32 %s650_s21, 4  ;;  %s545_s4 = int_to_ptr.vmem [resolvable:$false] %s544_s4 }
  0x2d   : > { %s546_s5 = scalar_lea.vmem %s545_s4, 2048  ;;  %p547_p12 = scmp.lt.s32.totalorder %s777_s24, %s545_s4 }
  0x2e   : > { %p542_p9 = pnand %p540_p6, %p526_p8  ;;  %p548_p3 = scmp.lt.s32.totalorder %s546_s5, %s539_s3 }
  0x30   : > { %p543_p2 = pneg %p542_p9  ;;  %p549_p11 = por %p548_p3, %p547_p12 }
  0x32   : > { %p550_p13 = pnand %p549_p11, %p543_p2 }
  0x34   : > { %553 = shalt.err (!%p550_p13)
}
  0x35   : > { %s651_s27 = smov 128   ;;  %s652_s22 = smov 8  }
  0x36   : > { %419 = dma.hbm_to_vmem [thread:$0]  (!%p781_p4), %s775_s23, 1024, %s777_s24, %s786_s26, %s651_s27, %s651_s27, %s652_s22  }
  0x37   : > { %p147_p5 = scmp.lt.s32.totalorder %s648_s16, 5  ;;  %p907_p8 = scmp.ge.s32.totalorder %s648_s16, 1 }
  0x39   : > { %p148_p10 = pnand %p907_p8, %p147_p5 }
  0x3a   : > { %s153_s9 = sand.u32 (!%p148_p10), 1, %s624_s10  }
  0x3b   : > { %151 = sbr.rel (%p148_p10) target bundleno = 209 (0xd1), region = 24  ;;  %s397_s17 = sshll.u32 (!%p148_p10), %s153_s9, 6 }
  0x3c   : > { %s154_s3 = scalar_lea.sflag (!%p148_p10), [#allocation3], %s153_s9  ;;  %s157_s21 = scalar_lea.vmem (!%p148_p10), [#allocation2], %s397_s17 }
  0x42   : > { %599 = dma.done.wait (%p745_p7), %s154_s3, 1024  }
  0x43   : > { %601 = vsyncadd (%p745_p7), %s154_s3, 4294966272  ;;  %s173_s4 = sand.u32 1, %s612_s7   ;;  %v183_v0 = vld [vmem:[%s157_s21 + $0x10] sm:$0xff]  ;;  %v181_v1 = vld [vmem:[%s157_s21] sm:$0xff]  ;;  %s653_s23 = smov 16   ;;  %vm221_vm0 = vcmask 130048  }
  0x44   : > { %201 = vrot.lane.b32.xlu1 %v183_v0, %s653_s23  ;;  %197 = vrot.lane.b32.xlu0 %v181_v1, %s653_s23  ;;  %v184_v2 = vld [vmem:[%s157_s21 + $0x18] sm:$0xff]  ;;  %v182_v3 = vld [vmem:[%s157_s21 + $0x8] sm:$0xff]  ;;  %s398_s25 = sshll.u32 %s173_s4, 6  ;;  %vm230_vm1 = vcmask 261120   ;;  %s240_s18 = scalar_lea.sflag [#allocation4], %s173_s4 }
  0x45   : > { %v186_v4 = vld [vmem:[%s157_s21 + $0x28] sm:$0xff]  ;;  %v185_v5 = vld [vmem:[%s157_s21 + $0x20] sm:$0xff]  ;;  %v188_v6 = vld [vmem:[%s157_s21 + $0x38] sm:$0xff]  ;;  %s175_s24 = scalar_lea.vmem [#allocation5], %s398_s25 }
  0x46   : > { %v187_v7 = vld [vmem:[%s157_s21 + $0x30] sm:$0xff] }
  0x48   : > { %203 = vrot.lane.b32.xlu1 %v184_v2, %s653_s23  ;;  %199 = vrot.lane.b32.xlu0 %v182_v3, %s653_s23 }
  0x4c   : > { %207 = vrot.lane.b32.xlu1 %v186_v4, %s653_s23  ;;  %205 = vrot.lane.b32.xlu0 %v185_v5, %s653_s23 }
  0x50   : > { %211 = vrot.lane.b32.xlu1 %v188_v6, %s653_s23  ;;  %209 = vrot.lane.b32.xlu0 %v187_v7, %s653_s23 }
  0xb6   : > { %v202_v8 = vpop.permute.xlu1 %201  ;;  %v198_v9 = vpop.permute.xlu0 %197 }
  0xb7   : > { %v224_v10 = vsel %vm221_vm0, %v183_v0, %v202_v8  ;;  %v222_v11 = vsel %vm221_vm0, %v181_v1, %v198_v9 }
  0xb8   : > { %233 = vst.msk [vmem:[%s175_s24 + $0x10] sm:$0xff] %vm230_vm1, %v224_v10  ;;  %231 = vst.msk [vmem:[%s175_s24] sm:$0xff] %vm230_vm1, %v222_v11 }
  0xba   : > { %v204_v12 = vpop.permute.xlu1 %203  ;;  %v200_v13 = vpop.permute.xlu0 %199 }
  0xbb   : > { %v225_v14 = vsel %vm221_vm0, %v184_v2, %v204_v12  ;;  %v223_v15 = vsel %vm221_vm0, %v182_v3, %v200_v13 }
  0xbc   : > { %234 = vst.msk [vmem:[%s175_s24 + $0x18] sm:$0xff] %vm230_vm1, %v225_v14  ;;  %232 = vst.msk [vmem:[%s175_s24 + $0x8] sm:$0xff] %vm230_vm1, %v223_v15 }
  0xbe   : > { %v208_v16 = vpop.permute.xlu1 %207  ;;  %v206_v17 = vpop.permute.xlu0 %205 }
  0xbf   : > { %v227_v18 = vsel %vm221_vm0, %v186_v4, %v208_v16  ;;  %v226_v19 = vsel %vm221_vm0, %v185_v5, %v206_v17 }
  0xc0   : > { %236 = vst.msk [vmem:[%s175_s24 + $0x28] sm:$0xff] %vm230_vm1, %v227_v18  ;;  %235 = vst.msk [vmem:[%s175_s24 + $0x20] sm:$0xff] %vm230_vm1, %v226_v19 }
  0xc2   : > { %v212_v20 = vpop.permute.xlu1 %211  ;;  %v210_v21 = vpop.permute.xlu0 %209 }
  0xc3   : > { %v229_v22 = vsel %vm221_vm0, %v188_v6, %v212_v20  ;;  %v228_v23 = vsel %vm221_vm0, %v187_v7, %v210_v21 }
  0xc4   : > { %238 = vst.msk [vmem:[%s175_s24 + $0x38] sm:$0xff] %vm230_vm1, %v229_v22  ;;  %237 = vst.msk [vmem:[%s175_s24 + $0x30] sm:$0xff] %vm230_vm1, %v228_v23 }
  0xc5   : > { %s400_s26 = sshll.u32 %s632_s12, 1  ;;  %s401_s5 = sshll.u32 %s636_s13, 4 }
  0xc6   : > { %s256_s27 = sadd.s32 %s401_s5, %s400_s26  ;;  %s275_s22 = sshll.u32 %s175_s24, 4  ;;  %s276_s22 = int_to_ptr.vmem [resolvable:$true] %s275_s22 }
  0xc7   : > { %s402_s9 = sshll.u32 %s256_s27, 7  ;;  %s654_s4 = smov 256  }
  0xc8   : > { %s258_s21 = scalar_lea.hbm %s900_s1, %s402_s9  ;;  %p908_p7 = scmp.ne.s32.totalorder %s904_s28, 0 }
  0xc9   : > { %s655_s23 = smov 512   ;;  %s656_s25 = smov 2  }
  0xca   : > { %408 = sst [smem:[#allocation7]] (%p908_p7), %s654_s4  ;;  %s657_s12 = smov 128  }
  0xcb   : > { %409 = sst [smem:[#allocation7 + $0x1]] (%p908_p7), %s655_s23  ;;  %s658_s13 = smov 8  }
  0xcc   : > { %410 = sst [smem:[#allocation7 + $0x2]] (%p908_p7), %s656_s25  ;;  %s659_s24 = smov [#allocation6]  }
  0xcd   : > { %411 = sst [smem:[#allocation7 + $0x3]] (%p908_p7), %s657_s12  ;;  %s660_s26 = smov 0  }
  0xce   : > { %412 = sst [smem:[#allocation7 + $0x4]] (%p908_p7), %s657_s12 }
  0xcf   : > { %413 = sst [smem:[#allocation7 + $0x5]] (%p908_p7), %s658_s13 }
  0xd0   : > { %414 = dma.general (%p908_p7), %s276_s22, 1024, %s258_s21, %s240_s18, %s659_s24, [#allocation7], %s660_s26, 0  }
  0xd1 PF: > { %p425_p12 = scmp.ge.s32.totalorder %s648_s16, 2  ;;  %s303_s5 = sand.u32 1, %s608_s6  }
  0xd2   : > { %p909_p2 = scmp.ne.s32.totalorder %s905_s2, 0  ;;  %s304_s27 = scalar_lea.sflag [#allocation4], %s303_s5 }
  0xd4   : > { %p421_p4 = pnand %p425_p12, %p909_p2 }
  0xd6   : > { %603 = dma.done.wait (!%p421_p4), %s304_s27, 1024  }
  0xd7   : > { %605 = vsyncadd (!%p421_p4), %s304_s27, 4294966272  ;;  %s17_s16 = sadd.s32 1, %s648_s16   ;;  %s910_s6 = smov %s612_s7 }
  0xd8   : > { %p14_p0 = scmp.ge.s32.totalorder %s17_s16, 6   ;;  %s911_s7 = smov %s616_s8 }
  0xd9   : > { %s912_s8 = smov %s761_s30  ;;  %s913_s9 = smov %s624_s10 }
  0xda   : > { %s914_s10 = smov %s628_s11  ;;  %s915_s11 = smov %s758_s29 }
  0xdb   : > { %s916_s12 = smov %s640_s14  ;;  %s917_s13 = smov %s644_s15 }
  0xdc   : > { %s918_s14 = smov %s921_s19  ;;  %s919_s15 = smov %s925_s20 }
  0xdd   :  { %16 = sbr.rel (!%p14_p0) target bundleno = 9 (0x9), region = 74 }
  0xe4   :  { %309 = vsyncpa [#allocation3], 1 }
  0xe5   :  { %311 = vsyncpa [#allocation3 + $0x1], 1 }
  0xe6   :  { %312 = vsyncpa [#allocation4], 1 }
  0xe7   :  { %314 = vsyncpa [#allocation4 + $0x1], 1 }

</bundles_post_ra>
